<compile_context>
chip_gen: v6e
topology: v6e:2x2x1
jax: 0.10.0
libtpu: 0.0.40
codegen_flags: <defaults>
</compile_context>

<pallas_src>
import functools

import jax
import jax.numpy as jnp
from jax.experimental import pallas as pl
from jax.experimental.pallas import tpu as pltpu


_LANE = 128      # TPU lane width (last dim)
_SUBLANE = 8     # TPU sublane width (second-to-last dim)


def _round_up(v, m):
    return (v + m - 1) // m * m


# ----------------------------------------------------------------------------
# Pallas kernel: one M-tile of  out = act(patches @ W + b)
# ----------------------------------------------------------------------------
def _matmul_bias_act_kernel(x_ref, w_ref, b_ref, o_ref, *, activation):
    # bf16 x bf16 -> f32 accumulate on the MXU.
    acc = jnp.dot(x_ref[...], w_ref[...], preferred_element_type=jnp.float32)
    acc = acc + b_ref[...]                      # (1, Np) broadcasts over rows, f32
    if activation == "relu":
        acc = jnp.maximum(acc, 0.0)             # VPU
    elif activation == "sigmoid":
        acc = jax.nn.sigmoid(acc)               # EUP transcendental, f32
    o_ref[...] = acc.astype(o_ref.dtype)


def _fused_matmul_act(patches, w_mat, bias, activation, *, tile_m=512):
    """act(patches @ w_mat + bias).

    patches: (M, K) f32, w_mat: (K, N) f32, bias: (N,) f32  ->  (M, N) f32.
    Tiled over M ("parallel"); weights/bias are pinned across the grid.
    """
    M, K = patches.shape
    N = w_mat.shape[1]
    Kp = _round_up(K, _LANE)
    Np = _round_up(N, _LANE)
    if M <= tile_m:
        tm = _round_up(max(M, _SUBLANE), _SUBLANE)
    else:
        tm = tile_m
    Mp = _round_up(M, tm)

    # jnp.pad fuses under jit (no standalone zero buffer + scatter).
    xp = jnp.pad(patches, ((0, Mp - M), (0, Kp - K))).astype(jnp.bfloat16)
    wp = jnp.pad(w_mat, ((0, Kp - K), (0, Np - N))).astype(jnp.bfloat16)
    bp = jnp.pad(bias, (0, Np - N)).astype(jnp.float32).reshape(1, Np)

    # Per-step VMEM (double-buffered): ~2*(tm*Kp*2 + tm*Np*4 + Kp*Np*2) bytes
    # ~= 1 MiB at tile_m=512, Kp=Np=128 -> fits every generation with big margin.
    out = pl.pallas_call(
        functools.partial(_matmul_bias_act_kernel, activation=activation),
        out_shape=jax.ShapeDtypeStruct((Mp, Np), jnp.float32),
        grid=(Mp // tm,),
        in_specs=[
            pl.BlockSpec((tm, Kp), lambda i: (i, 0)),    # patch rows: tiled on M
            pl.BlockSpec((Kp, Np), lambda i: (0, 0)),    # weights: pinned
            pl.BlockSpec((1, Np), lambda i: (0, 0)),     # bias: pinned
        ],
        out_specs=pl.BlockSpec((tm, Np), lambda i: (i, 0)),
        compiler_params=pltpu.CompilerParams(
            dimension_semantics=("parallel",),           # megacore splits M on v7x
            vmem_limit_bytes=32 * 1024 * 1024,
        ),
    )(xp, wp, bp)
    return out[:M, :N]


# ----------------------------------------------------------------------------
# NHWC patch extraction (plain-JAX glue; a single fused gather under jit —
# channel-axis concat of strided slices, no transpose/relayout needed).
# Tap ordering along the last axis is (kh, kw, c).
# ----------------------------------------------------------------------------
def _extract_patches_nhwc(x, K, stride, pad):
    N, H, W, C = x.shape
    xp = jnp.pad(x, ((0, 0), (pad, pad), (pad, pad), (0, 0)))
    H_out = (H + 2 * pad - K) // stride + 1
    W_out = (W + 2 * pad - K) // stride + 1
    taps = []
    for kh in range(K):
        for kw in range(K):
            taps.append(xp[:, kh:kh + stride * H_out:stride,
                              kw:kw + stride * W_out:stride, :])
    patches = jnp.concatenate(taps, axis=-1)          # (N, H_out, W_out, K*K*C)
    return patches, H_out, W_out


def conv2d_nhwc(x, w, b, *, stride, pad, activation):
    """Conv2d on NHWC input. w: (C_out, C_in, K, K) — PyTorch layout."""
    N = x.shape[0]
    C_out, C_in, K, _ = w.shape
    patches, H_out, W_out = _extract_patches_nhwc(x, K, stride, pad)
    M = N * H_out * W_out
    Kdim = K * K * C_in
    # rows ordered (kh, kw, c) to match the patch tap ordering
    w_mat = jnp.transpose(w, (2, 3, 1, 0)).reshape(Kdim, C_out)
    out = _fused_matmul_act(patches.reshape(M, Kdim), w_mat, b, activation)
    return out.reshape(N, H_out, W_out, C_out)


def conv_transpose2d_nhwc(x, w, b, *, activation):
    """ConvTranspose2d(k=3, s=2, p=1, output_padding=1) on NHWC input.

    w: (C_in, C_out, 3, 3) — PyTorch layout.

    Sub-pixel decomposition (no zero-dilated input): the output at
      (2i+dh, 2j+dw) depends only on the 2x2 input patch {x[i..i+1, j..j+1]}
    through a phase-specific subset of the (flipped) 3x3 taps.  We gather the
    2x2 patch once (K = 4*C_in), multiply by a combined weight whose columns
    are the 4 phases (N = 4*C_out) in ONE fused matmul, then pixel-shuffle.
    """
    N, H, W, C_in = x.shape
    C_out = w.shape[1]

    # 2x2 patch gather; x padded by 1 on bottom/right (covers output_padding=1).
    xp = jnp.pad(x, ((0, 0), (0, 1), (0, 1), (0, 0)))
    patches = jnp.concatenate([
        xp[:, 0:H,     0:W,     :],   # tap (0, 0) = x[i,   j  ]
        xp[:, 0:H,     1:W + 1, :],   # tap (0, 1) = x[i,   j+1]
        xp[:, 1:H + 1, 0:W,     :],   # tap (1, 0) = x[i+1, j  ]
        xp[:, 1:H + 1, 1:W + 1, :],   # tap (1, 1) = x[i+1, j+1]
    ], axis=-1)                        # (N, H, W, 4*C_in)

    # Flipped kernel, channels as (ci, co):  wf(kh, kw) = w[:, :, 2-kh, 2-kw]
    def wf(kh, kw):
        return w[:, :, 2 - kh, 2 - kw]

    z = jnp.zeros((C_in, C_out), w.dtype)
    # Column blocks = output phases (dh, dw); row blocks = taps (0,0),(0,1),(1,0),(1,1).
    col_ee = jnp.concatenate([wf(1, 1), z,        z,        z       ], axis=0)
    col_eo = jnp.concatenate([wf(1, 0), wf(1, 2), z,        z       ], axis=0)
    col_oe = jnp.concatenate([wf(0, 1), z,        wf(2, 1), z       ], axis=0)
    col_oo = jnp.concatenate([wf(0, 0), wf(0, 2), wf(2, 0), wf(2, 2)], axis=0)
    w_comb = jnp.concatenate([col_ee, col_eo, col_oe, col_oo], axis=1)  # (4C_in, 4C_out)
    b_comb = jnp.concatenate([b, b, b, b], axis=0)                       # (4C_out,)

    M = N * H * W
    out = _fused_matmul_act(patches.reshape(M, 4 * C_in), w_comb, b_comb, activation)

    # (M, 4*C_out) -> (N, H, W, dh, dw, C_out) -> pixel shuffle -> (N, 2H, 2W, C_out)
    out = out.reshape(N, H, W, 2, 2, C_out)
    out = out.transpose(0, 1, 3, 2, 4, 5).reshape(N, 2 * H, 2 * W, C_out)
    return out


# ----------------------------------------------------------------------------
# UNet (autoencoder) parameters + forward
# ----------------------------------------------------------------------------
def init_params(key, in_channels=1, latent_dim=16):
    ks = jax.random.split(key, 8)

    def u(k, shape, fan_in):
        bound = 1.0 / jnp.sqrt(fan_in)
        return jax.random.uniform(k, shape, jnp.float32, -bound, bound)

    p = {}
    # encoder: Conv2d(in,8,3,s2,p1), Conv2d(8,latent,3,s2,p1)
    p["e1_w"] = u(ks[0], (8, in_channels, 3, 3), in_channels * 9)
    p["e1_b"] = u(ks[1], (8,), in_channels * 9)
    p["e2_w"] = u(ks[2], (latent_dim, 8, 3, 3), 8 * 9)
    p["e2_b"] = u(ks[3], (latent_dim,), 8 * 9)
    # decoder: ConvT(latent,8,3,s2,p1,op1), ConvT(8,in,3,s2,p1,op1)
    p["d1_w"] = u(ks[4], (latent_dim, 8, 3, 3), 8 * 9)
    p["d1_b"] = u(ks[5], (8,), 8 * 9)
    p["d2_w"] = u(ks[6], (8, in_channels, 3, 3), in_channels * 9)
    p["d2_b"] = u(ks[7], (in_channels,), in_channels * 9)
    return p


def unet_forward(params, x):
    """Public API: NCHW in / NCHW out (PyTorch convention); NHWC internally."""
    h = jnp.transpose(x, (0, 2, 3, 1))                       # NCHW -> NHWC, once
    # encoder
    h = conv2d_nhwc(h, params["e1_w"], params["e1_b"], stride=2, pad=1,
                    activation="relu")
    h = conv2d_nhwc(h, params["e2_w"], params["e2_b"], stride=2, pad=1,
                    activation="relu")
    # decoder
    h = conv_transpose2d_nhwc(h, params["d1_w"], params["d1_b"],
                              activation="relu")
    h = conv_transpose2d_nhwc(h, params["d2_w"], params["d2_b"],
                              activation="sigmoid")
    return jnp.transpose(h, (0, 3, 1, 2))                    # NHWC -> NCHW, once


# ----------------------------------------------------------------------------
# Pure-JAX reference (f32, NCHW) for correctness checking
# ----------------------------------------------------------------------------
def _ref_forward(params, x):
    dn = ("NCHW", "OIHW", "NCHW")

    def conv(x, w, b):
        y = jax.lax.conv_general_dilated(x, w, (2, 2), ((1, 1), (1, 1)),
                                         dimension_numbers=dn)
        return y + b.reshape(1, -1, 1, 1)

    def convT(x, w, b):
        wf = jnp.flip(w, (2, 3)).transpose(1, 0, 2, 3)       # -> OIHW, O=C_out
        y = jax.lax.conv_general_dilated(x, wf, (1, 1), ((1, 2), (1, 2)),
                                         lhs_dilation=(2, 2),
                                         dimension_numbers=dn)
        return y + b.reshape(1, -1, 1, 1)

    h = jax.nn.relu(conv(x, params["e1_w"], params["e1_b"]))
    h = jax.nn.relu(conv(h, params["e2_w"], params["e2_b"]))
    h = jax.nn.relu(convT(h, params["d1_w"], params["d1_b"]))
    h = jax.nn.sigmoid(convT(h, params["d2_w"], params["d2_b"]))
    return h


if __name__ == "__main__":
    key = jax.random.PRNGKey(0)
    k_param, k_x = jax.random.split(key)

    in_channels, latent_dim = 1, 16
    params = init_params(k_param, in_channels=in_channels, latent_dim=latent_dim)

    fwd = jax.jit(unet_forward)
    ref_fwd = jax.jit(_ref_forward)

    # Small demo input (NCHW, matching the PyTorch module): batch=2, 1ch, 16x16.
    x = jax.random.normal(k_x, (2, in_channels, 16, 16), jnp.float32)
    out = jax.block_until_ready(fwd(params, x))
    assert out.shape == x.shape, out.shape
    assert bool(jnp.all(jnp.isfinite(out)))
    assert bool(jnp.all((out >= 0.0) & (out <= 1.0)))        # sigmoid range
    ref = jax.block_until_ready(ref_fwd(params, x))
    err = float(jnp.max(jnp.abs(out - ref)))
    assert err < 5e-2, f"max abs err vs reference: {err}"

    # Larger input exercises the multi-tile (grid > 1) path of the matmul kernel.
    x2 = jax.random.normal(jax.random.PRNGKey(1), (2, in_channels, 64, 64),
                           jnp.float32)
    out2 = jax.block_until_ready(fwd(params, x2))
    assert out2.shape == x2.shape, out2.shape
    ref2 = jax.block_until_ready(ref_fwd(params, x2))
    err2 = float(jnp.max(jnp.abs(out2 - ref2)))
    assert err2 < 5e-2, f"max abs err vs reference (large): {err2}"

    print("KERNEL_OK")
</pallas_src>

<mosaic_0001>
module attributes {stable_mosaic.version = 11 : i64} {
  func.func @_matmul_bias_act_kernel(%arg0: i32, %arg1: memref<128x128xbf16, #tpu.memory_space<vmem>>, %arg2: memref<128x128xbf16, #tpu.memory_space<vmem>>, %arg3: memref<1x128xf32, #tpu.memory_space<vmem>>, %arg4: memref<128x128xf32, #tpu.memory_space<vmem>>) attributes {dimension_semantics = [#tpu.dimension_semantics<parallel>], iteration_bounds = array<i64: 1>, scalar_prefetch = 0 : i64, scratch_operands = 0 : i64, tpu.core_type = #tpu.core_type<tc>, window_params = [{transform_indices = @transform_0, window_bounds = array<i64: 128, 128>}, {pipeline_mode = #tpu.pipeline_mode<synchronous>, transform_indices = @transform_1, window_bounds = array<i64: 128, 128>}, {pipeline_mode = #tpu.pipeline_mode<synchronous>, transform_indices = @transform_2, window_bounds = array<i64: 1, 128>}, {transform_indices = @transform_3, window_bounds = array<i64: 128, 128>}]} {
    %c0 = arith.constant 0 : index
    %c0_0 = arith.constant 0 : index
    %0 = vector.load %arg1[%c0, %c0_0] : memref<128x128xbf16, #tpu.memory_space<vmem>>, vector<128x128xbf16>
    %c0_1 = arith.constant 0 : index
    %c0_2 = arith.constant 0 : index
    %1 = vector.load %arg2[%c0_1, %c0_2] : memref<128x128xbf16, #tpu.memory_space<vmem>>, vector<128x128xbf16>
    %cst = arith.constant dense<0.000000e+00> : vector<128x128xf32>
    %2 = tpu.matmul %0, %1, %cst {dimension_numbers = #tpu.dot_dimension_numbers<[1], [0], [0], [1], [0, 0, 1, 1], [], []>} : vector<128x128xbf16>, vector<128x128xbf16>, vector<128x128xf32> -> vector<128x128xf32>
    %c0_3 = arith.constant 0 : index
    %c0_4 = arith.constant 0 : index
    %3 = vector.load %arg3[%c0_3, %c0_4] : memref<1x128xf32, #tpu.memory_space<vmem>>, vector<1x128xf32>
    %4 = vector.broadcast %3 : vector<1x128xf32> to vector<128x128xf32>
    %5 = arith.addf %2, %4 : vector<128x128xf32>
    %cst_5 = arith.constant 0.000000e+00 : f32
    %6 = vector.broadcast %cst_5 : f32 to vector<128x128xf32>
    %7 = arith.maximumf %5, %6 : vector<128x128xf32>
    %c0_6 = arith.constant 0 : index
    %c0_7 = arith.constant 0 : index
    %8 = vector.load %arg4[%c0_6, %c0_7] : memref<128x128xf32, #tpu.memory_space<vmem>>, vector<128x128xf32>
    tpu.vector_store %arg4[%c0_6, %c0_7], %7 {strides = array<i32>} : memref<128x128xf32, #tpu.memory_space<vmem>>, vector<128x128xf32>,
    return
  }
  func.func @transform_0(%arg0: i32) -> (i32, i32) {
    %c0_i32 = arith.constant 0 : i32
    %c0_i32_0 = arith.constant 0 : i32
    return %arg0, %c0_i32 : i32, i32
  }
  func.func @transform_1(%arg0: i32) -> (i32, i32) {
    %c0_i32 = arith.constant 0 : i32
    %c0_i32_0 = arith.constant 0 : i32
    %c0_i32_1 = arith.constant 0 : i32
    return %c0_i32, %c0_i32_0 : i32, i32
  }
  func.func @transform_2(%arg0: i32) -> (i32, i32) {
    %c0_i32 = arith.constant 0 : i32
    %c0_i32_0 = arith.constant 0 : i32
    %c0_i32_1 = arith.constant 0 : i32
    return %c0_i32, %c0_i32_0 : i32, i32
  }
  func.func @transform_3(%arg0: i32) -> (i32, i32) {
    %c0_i32 = arith.constant 0 : i32
    %c0_i32_0 = arith.constant 0 : i32
    return %arg0, %c0_i32 : i32, i32
  }
}

module attributes {stable_mosaic.version = 11 : i64} {
  func.func @_matmul_bias_act_kernel(%arg0: i32, %arg1: memref<32x128xbf16, #tpu.memory_space<vmem>>, %arg2: memref<128x128xbf16, #tpu.memory_space<vmem>>, %arg3: memref<1x128xf32, #tpu.memory_space<vmem>>, %arg4: memref<32x128xf32, #tpu.memory_space<vmem>>) attributes {dimension_semantics = [#tpu.dimension_semantics<parallel>], iteration_bounds = array<i64: 1>, scalar_prefetch = 0 : i64, scratch_operands = 0 : i64, tpu.core_type = #tpu.core_type<tc>, window_params = [{transform_indices = @transform_0, window_bounds = array<i64: 32, 128>}, {pipeline_mode = #tpu.pipeline_mode<synchronous>, transform_indices = @transform_1, window_bounds = array<i64: 128, 128>}, {pipeline_mode = #tpu.pipeline_mode<synchronous>, transform_indices = @transform_2, window_bounds = array<i64: 1, 128>}, {transform_indices = @transform_3, window_bounds = array<i64: 32, 128>}]} {
    %c0 = arith.constant 0 : index
    %c0_0 = arith.constant 0 : index
    %0 = vector.load %arg1[%c0, %c0_0] : memref<32x128xbf16, #tpu.memory_space<vmem>>, vector<32x128xbf16>
    %c0_1 = arith.constant 0 : index
    %c0_2 = arith.constant 0 : index
    %1 = vector.load %arg2[%c0_1, %c0_2] : memref<128x128xbf16, #tpu.memory_space<vmem>>, vector<128x128xbf16>
    %cst = arith.constant dense<0.000000e+00> : vector<32x128xf32>
    %2 = tpu.matmul %0, %1, %cst {dimension_numbers = #tpu.dot_dimension_numbers<[1], [0], [0], [1], [0, 0, 1, 1], [], []>} : vector<32x128xbf16>, vector<128x128xbf16>, vector<32x128xf32> -> vector<32x128xf32>
    %c0_3 = arith.constant 0 : index
    %c0_4 = arith.constant 0 : index
    %3 = vector.load %arg3[%c0_3, %c0_4] : memref<1x128xf32, #tpu.memory_space<vmem>>, vector<1x128xf32>
    %4 = vector.broadcast %3 : vector<1x128xf32> to vector<32x128xf32>
    %5 = arith.addf %2, %4 : vector<32x128xf32>
    %cst_5 = arith.constant 0.000000e+00 : f32
    %6 = vector.broadcast %cst_5 : f32 to vector<32x128xf32>
    %7 = arith.maximumf %5, %6 : vector<32x128xf32>
    %c0_6 = arith.constant 0 : index
    %c0_7 = arith.constant 0 : index
    %8 = vector.load %arg4[%c0_6, %c0_7] : memref<32x128xf32, #tpu.memory_space<vmem>>, vector<32x128xf32>
    tpu.vector_store %arg4[%c0_6, %c0_7], %7 {strides = array<i32>} : memref<32x128xf32, #tpu.memory_space<vmem>>, vector<32x128xf32>,
    return
  }
  func.func @transform_0(%arg0: i32) -> (i32, i32) {
    %c0_i32 = arith.constant 0 : i32
    %c0_i32_0 = arith.constant 0 : i32
    return %arg0, %c0_i32 : i32, i32
  }
  func.func @transform_1(%arg0: i32) -> (i32, i32) {
    %c0_i32 = arith.constant 0 : i32
    %c0_i32_0 = arith.constant 0 : i32
    %c0_i32_1 = arith.constant 0 : i32
    return %c0_i32, %c0_i32_0 : i32, i32
  }
  func.func @transform_2(%arg0: i32) -> (i32, i32) {
    %c0_i32 = arith.constant 0 : i32
    %c0_i32_0 = arith.constant 0 : i32
    %c0_i32_1 = arith.constant 0 : i32
    return %c0_i32, %c0_i32_0 : i32, i32
  }
  func.func @transform_3(%arg0: i32) -> (i32, i32) {
    %c0_i32 = arith.constant 0 : i32
    %c0_i32_0 = arith.constant 0 : i32
    return %arg0, %c0_i32 : i32, i32
  }
}

module attributes {stable_mosaic.version = 11 : i64} {
  func.func @_matmul_bias_act_kernel(%arg0: i32, %arg1: memref<128x128xbf16, #tpu.memory_space<vmem>>, %arg2: memref<128x128xbf16, #tpu.memory_space<vmem>>, %arg3: memref<1x128xf32, #tpu.memory_space<vmem>>, %arg4: memref<128x128xf32, #tpu.memory_space<vmem>>) attributes {dimension_semantics = [#tpu.dimension_semantics<parallel>], iteration_bounds = array<i64: 1>, scalar_prefetch = 0 : i64, scratch_operands = 0 : i64, tpu.core_type = #tpu.core_type<tc>, window_params = [{transform_indices = @transform_0, window_bounds = array<i64: 128, 128>}, {pipeline_mode = #tpu.pipeline_mode<synchronous>, transform_indices = @transform_1, window_bounds = array<i64: 128, 128>}, {pipeline_mode = #tpu.pipeline_mode<synchronous>, transform_indices = @transform_2, window_bounds = array<i64: 1, 128>}, {transform_indices = @transform_3, window_bounds = array<i64: 128, 128>}]} {
    %c0 = arith.constant 0 : index
    %c0_0 = arith.constant 0 : index
    %0 = vector.load %arg1[%c0, %c0_0] : memref<128x128xbf16, #tpu.memory_space<vmem>>, vector<128x128xbf16>
    %c0_1 = arith.constant 0 : index
    %c0_2 = arith.constant 0 : index
    %1 = vector.load %arg2[%c0_1, %c0_2] : memref<128x128xbf16, #tpu.memory_space<vmem>>, vector<128x128xbf16>
    %cst = arith.constant dense<0.000000e+00> : vector<128x128xf32>
    %2 = tpu.matmul %0, %1, %cst {dimension_numbers = #tpu.dot_dimension_numbers<[1], [0], [0], [1], [0, 0, 1, 1], [], []>} : vector<128x128xbf16>, vector<128x128xbf16>, vector<128x128xf32> -> vector<128x128xf32>
    %c0_3 = arith.constant 0 : index
    %c0_4 = arith.constant 0 : index
    %3 = vector.load %arg3[%c0_3, %c0_4] : memref<1x128xf32, #tpu.memory_space<vmem>>, vector<1x128xf32>
    %4 = vector.broadcast %3 : vector<1x128xf32> to vector<128x128xf32>
    %5 = arith.addf %2, %4 : vector<128x128xf32>
    %6 = arith.negf %5 : vector<128x128xf32>
    %7 = math.exp %6 : vector<128x128xf32>
    %cst_5 = arith.constant 1.000000e+00 : f32
    %8 = vector.broadcast %cst_5 : f32 to vector<128x128xf32>
    %9 = arith.addf %8, %7 : vector<128x128xf32>
    %10 = arith.divf %8, %9 : vector<128x128xf32>
    %c0_6 = arith.constant 0 : index
    %c0_7 = arith.constant 0 : index
    %11 = vector.load %arg4[%c0_6, %c0_7] : memref<128x128xf32, #tpu.memory_space<vmem>>, vector<128x128xf32>
    tpu.vector_store %arg4[%c0_6, %c0_7], %10 {strides = array<i32>} : memref<128x128xf32, #tpu.memory_space<vmem>>, vector<128x128xf32>,
    return
  }
  func.func @transform_0(%arg0: i32) -> (i32, i32) {
    %c0_i32 = arith.constant 0 : i32
    %c0_i32_0 = arith.constant 0 : i32
    return %arg0, %c0_i32 : i32, i32
  }
  func.func @transform_1(%arg0: i32) -> (i32, i32) {
    %c0_i32 = arith.constant 0 : i32
    %c0_i32_0 = arith.constant 0 : i32
    %c0_i32_1 = arith.constant 0 : i32
    return %c0_i32, %c0_i32_0 : i32, i32
  }
  func.func @transform_2(%arg0: i32) -> (i32, i32) {
    %c0_i32 = arith.constant 0 : i32
    %c0_i32_0 = arith.constant 0 : i32
    %c0_i32_1 = arith.constant 0 : i32
    return %c0_i32, %c0_i32_0 : i32, i32
  }
  func.func @transform_3(%arg0: i32) -> (i32, i32) {
    %c0_i32 = arith.constant 0 : i32
    %c0_i32_0 = arith.constant 0 : i32
    return %arg0, %c0_i32 : i32, i32
  }
}

</mosaic_0001>

<bundles_post_ra>
// kernel: unet_forward.4
= control target key start
LH: loop header
LB: loop body
LE: loop exit
PB: predicated region body
PF: predicated region fallthrough
CT: control target
= control target key end

     0   :  { %s499_s1 = inlined_call_operand.vmem [shape: bf16[128,128], index: 1, kind: input, shape index: {}]   ;;  %s500_s0 = inlined_call_operand.vmem [shape: bf16[128,128], index: 0, kind: input, shape index: {}]   ;;  %s501_s2 = inlined_call_operand.vmem [shape: f32[1,128], index: 2, kind: input, shape index: {}]   ;;  %s502_s3 = inlined_call_operand.vmem [shape: f32[128,128], index: 3, kind: output, shape index: {}]  }
   0x1   :  { %v364_v0 = vld [vmem:[%s499_s1 + $0x38] sm:$0xff]   ;;  %v365_v1 = vld [vmem:[%s499_s1 + $0x30] sm:$0xff]   ;;  %v366_v2 = vld [vmem:[%s499_s1 + $0x28] sm:$0xff]  }
   0x2   :  { %316 = vmatprep.subr.bf16.mxu0 %v364_v0  ;;  %348 = vmatprep.subr.bf16.mxu1 %v364_v0  ;;  %v367_v3 = vld [vmem:[%s499_s1 + $0x20] sm:$0xff]   ;;  %v368_v6 = vld [vmem:[%s499_s1 + $0x18] sm:$0xff]   ;;  %v369_v7 = vld [vmem:[%s499_s1 + $0x10] sm:$0xff]  }
   0x3   :  { %317 = vmatpush3.bf16.msra.mxu0 %v364_v0  ;;  %356 = vmatpush3.bf16.msra.mxu1 %v364_v0  ;;  %v372_v4 = vld [vmem:[%s500_s0] sm:$0xff]   ;;  %v370_v8 = vld [vmem:[%s499_s1 + $0x8] sm:$0xff]   ;;  %v376_v12 = vld [vmem:[%s500_s0 + $0x10] sm:$0xff]  }
   0x4   :  { %318 = vmatprep.subr.bf16.mxu0 %v365_v1  ;;  %349 = vmatprep.subr.bf16.mxu1 %v365_v1  ;;  %v373_v5 = vld [vmem:[%s500_s0 + $0x20] sm:$0xff]   ;;  %v374_v10 = vld [vmem:[%s500_s0 + $0x8] sm:$0xff]   ;;  %v377_v13 = vld [vmem:[%s500_s0 + $0x30] sm:$0xff]  }
   0x5   :  { %332 = vmatprep.mubr.bf16.mxu0 %v372_v4  ;;  %340 = vmatprep.mubr.bf16.mxu1 %v373_v5  ;;  %v371_v9 = vld [vmem:[%s499_s1] sm:$0xff]   ;;  %v375_v11 = vld [vmem:[%s500_s0 + $0x28] sm:$0xff]   ;;  %v378_v14 = vld [vmem:[%s500_s0 + $0x18] sm:$0xff]  }
   0x6   :  { %v379_v15 = vld [vmem:[%s500_s0 + $0x38] sm:$0xff]   ;;  %v283_v16 = vld [vmem:[%s501_s2] ss:$0 sm:$0xff] }
   0x7   :  { %319 = vmatpush3.bf16.msra.mxu0 %v365_v1  ;;  %357 = vmatpush3.bf16.msra.mxu1 %v365_v1 }
   0x8   :  { %320 = vmatprep.subr.bf16.mxu0 %v366_v2  ;;  %350 = vmatprep.subr.bf16.mxu1 %v366_v2 }
   0xb   :  { %321 = vmatpush3.bf16.msra.mxu0 %v366_v2  ;;  %358 = vmatpush3.bf16.msra.mxu1 %v366_v2 }
   0xc   :  { %322 = vmatprep.subr.bf16.mxu0 %v367_v3  ;;  %351 = vmatprep.subr.bf16.mxu1 %v367_v3 }
   0xf   :  { %323 = vmatpush3.bf16.msra.mxu0 %v367_v3  ;;  %359 = vmatpush3.bf16.msra.mxu1 %v367_v3 }
  0x10   :  { %324 = vmatprep.subr.bf16.mxu0 %v368_v6  ;;  %352 = vmatprep.subr.bf16.mxu1 %v368_v6 }
  0x13   :  { %325 = vmatpush3.bf16.msra.mxu0 %v368_v6  ;;  %360 = vmatpush3.bf16.msra.mxu1 %v368_v6 }
  0x14   :  { %326 = vmatprep.subr.bf16.mxu0 %v369_v7  ;;  %353 = vmatprep.subr.bf16.mxu1 %v369_v7 }
  0x17   :  { %327 = vmatpush3.bf16.msra.mxu0 %v369_v7  ;;  %361 = vmatpush3.bf16.msra.mxu1 %v369_v7 }
  0x18   :  { %328 = vmatprep.subr.bf16.mxu0 %v370_v8  ;;  %354 = vmatprep.subr.bf16.mxu1 %v370_v8 }
  0x1b   :  { %329 = vmatpush3.bf16.msra.mxu0 %v370_v8  ;;  %362 = vmatpush3.bf16.msra.mxu1 %v370_v8 }
  0x1c   :  { %330 = vmatprep.subr.bf16.mxu0 %v371_v9  ;;  %355 = vmatprep.subr.bf16.mxu1 %v371_v9 }
  0x1f   :  { %331 = vmatpush3.bf16.msra.mxu0 %v371_v9  ;;  %363 = vmatpush3.bf16.msra.mxu1 %v371_v9 }
  0x22   :  { %333 = vmatmul.mubr.bf16.vlgmr.msra.gmra.mxu0 %v374_v10  ;;  %341 = vmatmul.mubr.bf16.vlgmr.msra.gmra.mxu1 %v375_v11 }
  0x23   :  { %336 = vmatprep.mubr.bf16.mxu0 %v376_v12  ;;  %344 = vmatprep.mubr.bf16.mxu1 %v377_v13 }
  0x2a   :  { %337 = vmatmul.mubr.bf16.gmra.mxu0 %v378_v14  ;;  %345 = vmatmul.mubr.bf16.gmra.mxu1 %v379_v15 }
  0xe2   :  { %v334_v17 = vpop.f32.mrf.mxu0  ;;  %v342_v18 = vpop.f32.mrf.mxu1 }
  0xe3   :  { %v193_v19 = vadd.f32 %v334_v17, %v283_v16  ;;  %v225_v20 = vadd.f32 %v342_v18, %v283_v16 }
  0xe4   :  { %v184_v21 = vpop.f32.mrf.mxu0  ;;  %v216_v22 = vpop.f32.mrf.mxu1 }
  0xe5   :  { %v249_v23 = vmax.f32 %v193_v19, 0.0  ;;  %v257_v24 = vmax.f32 %v225_v20, 0.0  ;;  %v185_v25 = vadd.f32 %v283_v16, %v184_v21  ;;  %v217_v26 = vadd.f32 %v283_v16, %v216_v22 }
  0xe6   :  { %v335_v27 = vpop.f32.mrf.mxu0  ;;  %v343_v28 = vpop.f32.mrf.mxu1 }
  0xe7   :  { %265 = vst [vmem:[%s502_s3 + $0x10] sm:$0xff] %v249_v23  ;;  %273 = vst [vmem:[%s502_s3 + $0x50] sm:$0xff] %v257_v24  ;;  %v247_v29 = vmax.f32 %v185_v25, 0.0  ;;  %v255_v30 = vmax.f32 %v217_v26, 0.0  ;;  %v196_v31 = vadd.f32 %v335_v27, %v283_v16  ;;  %v228_v32 = vadd.f32 %v343_v28, %v283_v16 }
  0xe8   :  { %v187_v33 = vpop.f32.mrf.mxu0  ;;  %v219_v34 = vpop.f32.mrf.mxu1 }
  0xe9   :  { %263 = vst [vmem:[%s502_s3] sm:$0xff] %v247_v29  ;;  %271 = vst [vmem:[%s502_s3 + $0x40] sm:$0xff] %v255_v30  ;;  %v250_v35 = vmax.f32 %v196_v31, 0.0  ;;  %v258_v36 = vmax.f32 %v228_v32, 0.0  ;;  %v188_v37 = vadd.f32 %v283_v16, %v187_v33  ;;  %v220_v38 = vadd.f32 %v283_v16, %v219_v34 }
  0xea   :  { %v338_v39 = vpop.f32.mrf.mxu0  ;;  %v346_v40 = vpop.f32.mrf.mxu1 }
  0xeb   :  { %266 = vst [vmem:[%s502_s3 + $0x18] sm:$0xff] %v250_v35  ;;  %274 = vst [vmem:[%s502_s3 + $0x58] sm:$0xff] %v258_v36  ;;  %v248_v41 = vmax.f32 %v188_v37, 0.0  ;;  %v256_v42 = vmax.f32 %v220_v38, 0.0  ;;  %v209_v43 = vadd.f32 %v338_v39, %v283_v16  ;;  %v241_v44 = vadd.f32 %v346_v40, %v283_v16 }
  0xec   :  { %v200_v45 = vpop.f32.mrf.mxu0  ;;  %v232_v46 = vpop.f32.mrf.mxu1 }
  0xed   :  { %264 = vst [vmem:[%s502_s3 + $0x8] sm:$0xff] %v248_v41  ;;  %272 = vst [vmem:[%s502_s3 + $0x48] sm:$0xff] %v256_v42  ;;  %v253_v47 = vmax.f32 %v209_v43, 0.0  ;;  %v261_v48 = vmax.f32 %v241_v44, 0.0  ;;  %v201_v49 = vadd.f32 %v283_v16, %v200_v45  ;;  %v233_v50 = vadd.f32 %v283_v16, %v232_v46 }
  0xee   :  { %v339_v51 = vpop.f32.mrf.mxu0  ;;  %v347_v52 = vpop.f32.mrf.mxu1 }
  0xef   :  { %269 = vst [vmem:[%s502_s3 + $0x30] sm:$0xff] %v253_v47  ;;  %277 = vst [vmem:[%s502_s3 + $0x70] sm:$0xff] %v261_v48  ;;  %v251_v53 = vmax.f32 %v201_v49, 0.0  ;;  %v259_v54 = vmax.f32 %v233_v50, 0.0  ;;  %v212_v55 = vadd.f32 %v339_v51, %v283_v16  ;;  %v244_v56 = vadd.f32 %v347_v52, %v283_v16 }
  0xf0   :  { %v203_v57 = vpop.f32.mrf.mxu0  ;;  %v235_v58 = vpop.f32.mrf.mxu1 }
  0xf1   :  { %267 = vst [vmem:[%s502_s3 + $0x20] sm:$0xff] %v251_v53  ;;  %275 = vst [vmem:[%s502_s3 + $0x60] sm:$0xff] %v259_v54  ;;  %v254_v59 = vmax.f32 %v212_v55, 0.0  ;;  %v262_v60 = vmax.f32 %v244_v56, 0.0  ;;  %v204_v61 = vadd.f32 %v283_v16, %v203_v57  ;;  %v236_v62 = vadd.f32 %v283_v16, %v235_v58 }
  0xf3   :  { %270 = vst [vmem:[%s502_s3 + $0x38] sm:$0xff] %v254_v59  ;;  %278 = vst [vmem:[%s502_s3 + $0x78] sm:$0xff] %v262_v60  ;;  %v252_v63 = vmax.f32 %v204_v61, 0.0  ;;  %v260_v0 = vmax.f32 %v236_v62, 0.0 }
  0xf5   :  { %268 = vst [vmem:[%s502_s3 + $0x28] sm:$0xff] %v252_v63  ;;  %276 = vst [vmem:[%s502_s3 + $0x68] sm:$0xff] %v260_v0 }

// kernel: unet_forward.5
= control target key start
LH: loop header
LB: loop body
LE: loop exit
PB: predicated region body
PF: predicated region fallthrough
CT: control target
= control target key end

     0   :  { %s279_s1 = inlined_call_operand.vmem [shape: bf16[128,128], index: 1, kind: input, shape index: {}]   ;;  %s280_s0 = inlined_call_operand.vmem [shape: bf16[32,128], index: 0, kind: input, shape index: {}]   ;;  %s281_s2 = inlined_call_operand.vmem [shape: f32[1,128], index: 2, kind: input, shape index: {}]   ;;  %s282_s3 = inlined_call_operand.vmem [shape: f32[32,128], index: 3, kind: output, shape index: {}]  }
   0x1   :  { %v204_v0 = vld [vmem:[%s279_s1 + $0x38] sm:$0xff]   ;;  %v205_v1 = vld [vmem:[%s279_s1 + $0x30] sm:$0xff]   ;;  %v206_v2 = vld [vmem:[%s279_s1 + $0x28] sm:$0xff]  }
   0x2   :  { %184 = vmatprep.subr.bf16.mxu0 %v204_v0  ;;  %v207_v3 = vld [vmem:[%s279_s1 + $0x20] sm:$0xff]   ;;  %v208_v5 = vld [vmem:[%s279_s1 + $0x18] sm:$0xff]   ;;  %v209_v6 = vld [vmem:[%s279_s1 + $0x10] sm:$0xff]  }
   0x3   :  { %185 = vmatpush3.bf16.msra.mxu0 %v204_v0  ;;  %v212_v4 = vld [vmem:[%s280_s0] sm:$0xff]   ;;  %v210_v7 = vld [vmem:[%s279_s1 + $0x8] sm:$0xff]  }
   0x4   :  { %186 = vmatprep.subr.bf16.mxu0 %v205_v1  ;;  %200 = vmatprep.mubr.bf16.mxu0 %v212_v4  ;;  %v211_v8 = vld [vmem:[%s279_s1] sm:$0xff]   ;;  %v213_v9 = vld [vmem:[%s280_s0 + $0x8] sm:$0xff]  }
   0x5   :  { %v163_v10 = vld [vmem:[%s281_s2] ss:$0 sm:$0xff] }
   0x7   :  { %187 = vmatpush3.bf16.msra.mxu0 %v205_v1 }
   0x8   :  { %188 = vmatprep.subr.bf16.mxu0 %v206_v2 }
   0xb   :  { %189 = vmatpush3.bf16.msra.mxu0 %v206_v2 }
   0xc   :  { %190 = vmatprep.subr.bf16.mxu0 %v207_v3 }
   0xf   :  { %191 = vmatpush3.bf16.msra.mxu0 %v207_v3 }
  0x10   :  { %192 = vmatprep.subr.bf16.mxu0 %v208_v5 }
  0x13   :  { %193 = vmatpush3.bf16.msra.mxu0 %v208_v5 }
  0x14   :  { %194 = vmatprep.subr.bf16.mxu0 %v209_v6 }
  0x17   :  { %195 = vmatpush3.bf16.msra.mxu0 %v209_v6 }
  0x18   :  { %196 = vmatprep.subr.bf16.mxu0 %v210_v7 }
  0x1b   :  { %197 = vmatpush3.bf16.msra.mxu0 %v210_v7 }
  0x1c   :  { %198 = vmatprep.subr.bf16.mxu0 %v211_v8 }
  0x1f   :  { %199 = vmatpush3.bf16.msra.mxu0 %v211_v8 }
  0x22   :  { %201 = vmatmul.mubr.bf16.vlgmr.msra.gmra.mxu0 %v213_v9 }
  0xe2   :  { %v202_v11 = vpop.f32.mrf.mxu0 }
  0xe3   :  { %v145_v12 = vadd.f32 %v202_v11, %v163_v10 }
  0xe4   :  { %v136_v13 = vpop.f32.mrf.mxu0 }
  0xe5   :  { %v153_v14 = vmax.f32 %v145_v12, 0.0  ;;  %v137_v15 = vadd.f32 %v163_v10, %v136_v13 }
  0xe6   :  { %v203_v16 = vpop.f32.mrf.mxu0 }
  0xe7   :  { %157 = vst [vmem:[%s282_s3 + $0x10] sm:$0xff] %v153_v14  ;;  %v151_v17 = vmax.f32 %v137_v15, 0.0  ;;  %v148_v18 = vadd.f32 %v203_v16, %v163_v10 }
  0xe8   :  { %v139_v19 = vpop.f32.mrf.mxu0 }
  0xe9   :  { %155 = vst [vmem:[%s282_s3] sm:$0xff] %v151_v17  ;;  %v154_v20 = vmax.f32 %v148_v18, 0.0  ;;  %v140_v21 = vadd.f32 %v163_v10, %v139_v19 }
  0xeb   :  { %158 = vst [vmem:[%s282_s3 + $0x18] sm:$0xff] %v154_v20  ;;  %v152_v22 = vmax.f32 %v140_v21, 0.0 }
  0xed   :  { %156 = vst [vmem:[%s282_s3 + $0x8] sm:$0xff] %v152_v22 }

// kernel: unet_forward.7
= control target key start
LH: loop header
LB: loop body
LE: loop exit
PB: predicated region body
PF: predicated region fallthrough
CT: control target
= control target key end

     0   :  { %s659_s1 = inlined_call_operand.vmem [shape: bf16[128,128], index: 1, kind: input, shape index: {}]   ;;  %s660_s0 = inlined_call_operand.vmem [shape: bf16[128,128], index: 0, kind: input, shape index: {}]   ;;  %s661_s2 = inlined_call_operand.vmem [shape: f32[1,128], index: 2, kind: input, shape index: {}]   ;;  %s662_s3 = inlined_call_operand.vmem [shape: f32[128,128], index: 3, kind: output, shape index: {}]  }
   0x1   :  { %v460_v0 = vld [vmem:[%s659_s1 + $0x38] sm:$0xff]   ;;  %v461_v1 = vld [vmem:[%s659_s1 + $0x30] sm:$0xff]   ;;  %v462_v2 = vld [vmem:[%s659_s1 + $0x28] sm:$0xff]  }
   0x2   :  { %412 = vmatprep.subr.bf16.mxu0 %v460_v0  ;;  %444 = vmatprep.subr.bf16.mxu1 %v460_v0  ;;  %v463_v3 = vld [vmem:[%s659_s1 + $0x20] sm:$0xff]   ;;  %v464_v6 = vld [vmem:[%s659_s1 + $0x18] sm:$0xff]   ;;  %v465_v7 = vld [vmem:[%s659_s1 + $0x10] sm:$0xff]  }
   0x3   :  { %413 = vmatpush3.bf16.msra.mxu0 %v460_v0  ;;  %452 = vmatpush3.bf16.msra.mxu1 %v460_v0  ;;  %v468_v4 = vld [vmem:[%s660_s0] sm:$0xff]   ;;  %v466_v8 = vld [vmem:[%s659_s1 + $0x8] sm:$0xff]   ;;  %v472_v12 = vld [vmem:[%s660_s0 + $0x10] sm:$0xff]  }
   0x4   :  { %414 = vmatprep.subr.bf16.mxu0 %v461_v1  ;;  %445 = vmatprep.subr.bf16.mxu1 %v461_v1  ;;  %v469_v5 = vld [vmem:[%s660_s0 + $0x20] sm:$0xff]   ;;  %v470_v10 = vld [vmem:[%s660_s0 + $0x8] sm:$0xff]   ;;  %v473_v13 = vld [vmem:[%s660_s0 + $0x30] sm:$0xff]  }
   0x5   :  { %428 = vmatprep.mubr.bf16.mxu0 %v468_v4  ;;  %436 = vmatprep.mubr.bf16.mxu1 %v469_v5  ;;  %v467_v9 = vld [vmem:[%s659_s1] sm:$0xff]   ;;  %v471_v11 = vld [vmem:[%s660_s0 + $0x28] sm:$0xff]   ;;  %v474_v14 = vld [vmem:[%s660_s0 + $0x18] sm:$0xff]  }
   0x6   :  { %v475_v15 = vld [vmem:[%s660_s0 + $0x38] sm:$0xff]   ;;  %v363_v16 = vld [vmem:[%s661_s2] ss:$0 sm:$0xff] }
   0x7   :  { %415 = vmatpush3.bf16.msra.mxu0 %v461_v1  ;;  %453 = vmatpush3.bf16.msra.mxu1 %v461_v1 }
   0x8   :  { %416 = vmatprep.subr.bf16.mxu0 %v462_v2  ;;  %446 = vmatprep.subr.bf16.mxu1 %v462_v2 }
   0xb   :  { %417 = vmatpush3.bf16.msra.mxu0 %v462_v2  ;;  %454 = vmatpush3.bf16.msra.mxu1 %v462_v2 }
   0xc   :  { %418 = vmatprep.subr.bf16.mxu0 %v463_v3  ;;  %447 = vmatprep.subr.bf16.mxu1 %v463_v3 }
   0xf   :  { %419 = vmatpush3.bf16.msra.mxu0 %v463_v3  ;;  %455 = vmatpush3.bf16.msra.mxu1 %v463_v3 }
  0x10   :  { %420 = vmatprep.subr.bf16.mxu0 %v464_v6  ;;  %448 = vmatprep.subr.bf16.mxu1 %v464_v6 }
  0x13   :  { %421 = vmatpush3.bf16.msra.mxu0 %v464_v6  ;;  %456 = vmatpush3.bf16.msra.mxu1 %v464_v6 }
  0x14   :  { %422 = vmatprep.subr.bf16.mxu0 %v465_v7  ;;  %449 = vmatprep.subr.bf16.mxu1 %v465_v7 }
  0x17   :  { %423 = vmatpush3.bf16.msra.mxu0 %v465_v7  ;;  %457 = vmatpush3.bf16.msra.mxu1 %v465_v7 }
  0x18   :  { %424 = vmatprep.subr.bf16.mxu0 %v466_v8  ;;  %450 = vmatprep.subr.bf16.mxu1 %v466_v8 }
  0x1b   :  { %425 = vmatpush3.bf16.msra.mxu0 %v466_v8  ;;  %458 = vmatpush3.bf16.msra.mxu1 %v466_v8 }
  0x1c   :  { %426 = vmatprep.subr.bf16.mxu0 %v467_v9  ;;  %451 = vmatprep.subr.bf16.mxu1 %v467_v9 }
  0x1f   :  { %427 = vmatpush3.bf16.msra.mxu0 %v467_v9  ;;  %459 = vmatpush3.bf16.msra.mxu1 %v467_v9 }
  0x22   :  { %429 = vmatmul.mubr.bf16.vlgmr.msra.gmra.mxu0 %v470_v10  ;;  %437 = vmatmul.mubr.bf16.vlgmr.msra.gmra.mxu1 %v471_v11 }
  0x23   :  { %432 = vmatprep.mubr.bf16.mxu0 %v472_v12  ;;  %440 = vmatprep.mubr.bf16.mxu1 %v473_v13 }
  0x2a   :  { %433 = vmatmul.mubr.bf16.gmra.mxu0 %v474_v14  ;;  %441 = vmatmul.mubr.bf16.gmra.mxu1 %v475_v15 }
  0xe2   :  { %v430_v17 = vpop.f32.mrf.mxu0  ;;  %v438_v18 = vpop.f32.mrf.mxu1 }
  0xe3   :  { %v193_v19 = vadd.f32 %v430_v17, %v363_v16  ;;  %v225_v20 = vadd.f32 %v438_v18, %v363_v16 }
  0xe4   :  { %v184_v21 = vpop.f32.mrf.mxu0  ;;  %v216_v22 = vpop.f32.mrf.mxu1 }
  0xe5   :  { %v382_v23 = vmul.f32 -1.442695, %v193_v19  ;;  %v390_v24 = vmul.f32 -1.442695, %v225_v20  ;;  %v185_v25 = vadd.f32 %v363_v16, %v184_v21  ;;  %v217_v26 = vadd.f32 %v363_v16, %v216_v22 }
  0xe6   :  { %v431_v27 = vpop.f32.mrf.mxu0  ;;  %v439_v28 = vpop.f32.mrf.mxu1 }
  0xe7   :  { %476 = vpow2.f32 %v382_v23  ;;  %v380_v29 = vmul.f32 -1.442695, %v185_v25  ;;  %v388_v30 = vmul.f32 -1.442695, %v217_v26  ;;  %v196_v31 = vadd.f32 %v431_v27, %v363_v16 }
  0xe8   :  { %478 = vpow2.f32 %v390_v24  ;;  %v228_v32 = vadd.f32 %v439_v28, %v363_v16  ;;  %v187_v33 = vpop.f32.mrf.mxu0  ;;  %v219_v34 = vpop.f32.mrf.mxu1 }
  0xe9   :  { %480 = vpow2.f32 %v380_v29  ;;  %v383_v35 = vmul.f32 -1.442695, %v196_v31  ;;  %v188_v36 = vadd.f32 %v363_v16, %v187_v33  ;;  %v220_v37 = vadd.f32 %v363_v16, %v219_v34 }
  0xea   :  { %482 = vpow2.f32 %v388_v30  ;;  %v391_v38 = vmul.f32 -1.442695, %v228_v32  ;;  %v434_v39 = vpop.f32.mrf.mxu0  ;;  %v442_v40 = vpop.f32.mrf.mxu1 }
  0xeb   :  { %484 = vpow2.f32 %v383_v35  ;;  %v381_v41 = vmul.f32 -1.442695, %v188_v36  ;;  %v389_v42 = vmul.f32 -1.442695, %v220_v37  ;;  %v209_v43 = vadd.f32 %v434_v39, %v363_v16 }
  0xec   :  { %486 = vpow2.f32 %v391_v38  ;;  %v241_v44 = vadd.f32 %v442_v40, %v363_v16  ;;  %v200_v45 = vpop.f32.mrf.mxu0  ;;  %v232_v46 = vpop.f32.mrf.mxu1 }
  0xed   :  { %488 = vpow2.f32 %v381_v41  ;;  %v386_v47 = vmul.f32 -1.442695, %v209_v43  ;;  %v201_v48 = vadd.f32 %v363_v16, %v200_v45  ;;  %v233_v49 = vadd.f32 %v363_v16, %v232_v46 }
  0xee   :  { %490 = vpow2.f32 %v389_v42  ;;  %v394_v50 = vmul.f32 -1.442695, %v241_v44  ;;  %v435_v51 = vpop.f32.mrf.mxu0  ;;  %v443_v52 = vpop.f32.mrf.mxu1 }
  0xef   :  { %492 = vpow2.f32 %v386_v47  ;;  %v384_v53 = vmul.f32 -1.442695, %v201_v48  ;;  %v392_v54 = vmul.f32 -1.442695, %v233_v49  ;;  %v212_v55 = vadd.f32 %v435_v51, %v363_v16 }
  0xf0   :  { %494 = vpow2.f32 %v394_v50  ;;  %v244_v56 = vadd.f32 %v443_v52, %v363_v16  ;;  %v203_v57 = vpop.f32.mrf.mxu0  ;;  %v235_v58 = vpop.f32.mrf.mxu1 }
  0xf1   :  { %496 = vpow2.f32 %v384_v53  ;;  %v387_v59 = vmul.f32 -1.442695, %v212_v55  ;;  %v204_v60 = vadd.f32 %v363_v16, %v203_v57  ;;  %v236_v61 = vadd.f32 %v363_v16, %v235_v58 }
  0xf2   :  { %498 = vpow2.f32 %v392_v54  ;;  %v395_v62 = vmul.f32 -1.442695, %v244_v56 }
  0xf3   :  { %500 = vpow2.f32 %v387_v59  ;;  %v385_v63 = vmul.f32 -1.442695, %v204_v60  ;;  %v393_v0 = vmul.f32 -1.442695, %v236_v61 }
  0xf4   :  { %v477_v1 = vpop.eup %476  ;;  %502 = vpow2.f32 %v395_v62 }
  0xf5   :  { %v479_v2 = vpop.eup %478  ;;  %v297_v3 = vadd.f32 1.0, %v477_v1  ;;  %504 = vpow2.f32 %v385_v63 }
  0xf6   :  { %v481_v4 = vpop.eup %480  ;;  %v305_v5 = vadd.f32 1.0, %v479_v2  ;;  %506 = vpow2.f32 %v393_v0 }
  0xf7   :  { %v483_v6 = vpop.eup %482  ;;  %508 = vrcp.f32 %v297_v3  ;;  %v295_v7 = vadd.f32 1.0, %v481_v4 }
  0xf8   :  { %v485_v8 = vpop.eup %484  ;;  %510 = vrcp.f32 %v305_v5  ;;  %v303_v9 = vadd.f32 1.0, %v483_v6 }
  0xf9   :  { %v487_v10 = vpop.eup %486  ;;  %512 = vrcp.f32 %v295_v7  ;;  %v298_v11 = vadd.f32 1.0, %v485_v8 }
  0xfa   :  { %v489_v12 = vpop.eup %488  ;;  %514 = vrcp.f32 %v303_v9  ;;  %v306_v13 = vadd.f32 1.0, %v487_v10 }
  0xfb   :  { %v491_v14 = vpop.eup %490  ;;  %516 = vrcp.f32 %v298_v11  ;;  %v296_v15 = vadd.f32 1.0, %v489_v12 }
  0xfc   :  { %v493_v16 = vpop.eup %492  ;;  %518 = vrcp.f32 %v306_v13  ;;  %v304_v17 = vadd.f32 1.0, %v491_v14 }
  0xfd   :  { %v495_v18 = vpop.eup %494  ;;  %520 = vrcp.f32 %v296_v15  ;;  %v301_v19 = vadd.f32 1.0, %v493_v16 }
  0xfe   :  { %v497_v20 = vpop.eup %496  ;;  %522 = vrcp.f32 %v304_v17  ;;  %v309_v21 = vadd.f32 1.0, %v495_v18 }
  0xff   :  { %v499_v22 = vpop.eup %498  ;;  %524 = vrcp.f32 %v301_v19  ;;  %v299_v23 = vadd.f32 1.0, %v497_v20 }
 0x100   :  { %v501_v24 = vpop.eup %500  ;;  %526 = vrcp.f32 %v309_v21  ;;  %v307_v25 = vadd.f32 1.0, %v499_v22 }
 0x101   :  { %v503_v26 = vpop.eup %502  ;;  %528 = vrcp.f32 %v299_v23  ;;  %v302_v27 = vadd.f32 1.0, %v501_v24 }
 0x102   :  { %v505_v28 = vpop.eup %504  ;;  %530 = vrcp.f32 %v307_v25  ;;  %v310_v29 = vadd.f32 1.0, %v503_v26 }
 0x103   :  { %v507_v30 = vpop.eup %506  ;;  %532 = vrcp.f32 %v302_v27  ;;  %v300_v31 = vadd.f32 1.0, %v505_v28 }
 0x104   :  { %v509_v32 = vpop.eup %508  ;;  %534 = vrcp.f32 %v310_v29  ;;  %v308_v33 = vadd.f32 1.0, %v507_v30 }
 0x105   :  { %v511_v34 = vpop.eup %510  ;;  %345 = vst [vmem:[%s662_s3 + $0x10] sm:$0xff] %v509_v32  ;;  %536 = vrcp.f32 %v300_v31 }
 0x106   :  { %v513_v35 = vpop.eup %512  ;;  %353 = vst [vmem:[%s662_s3 + $0x50] sm:$0xff] %v511_v34  ;;  %538 = vrcp.f32 %v308_v33 }
 0x107   :  { %v515_v36 = vpop.eup %514  ;;  %343 = vst [vmem:[%s662_s3] sm:$0xff] %v513_v35 }
 0x108   :  { %v517_v37 = vpop.eup %516  ;;  %351 = vst [vmem:[%s662_s3 + $0x40] sm:$0xff] %v515_v36 }
 0x109   :  { %v519_v38 = vpop.eup %518  ;;  %346 = vst [vmem:[%s662_s3 + $0x18] sm:$0xff] %v517_v37 }
 0x10a   :  { %v521_v39 = vpop.eup %520  ;;  %354 = vst [vmem:[%s662_s3 + $0x58] sm:$0xff] %v519_v38 }
 0x10b   :  { %v523_v40 = vpop.eup %522  ;;  %344 = vst [vmem:[%s662_s3 + $0x8] sm:$0xff] %v521_v39 }
 0x10c   :  { %v525_v41 = vpop.eup %524  ;;  %352 = vst [vmem:[%s662_s3 + $0x48] sm:$0xff] %v523_v40 }
 0x10d   :  { %v527_v42 = vpop.eup %526  ;;  %349 = vst [vmem:[%s662_s3 + $0x30] sm:$0xff] %v525_v41 }
 0x10e   :  { %v529_v43 = vpop.eup %528  ;;  %357 = vst [vmem:[%s662_s3 + $0x70] sm:$0xff] %v527_v42 }
 0x10f   :  { %v531_v44 = vpop.eup %530  ;;  %347 = vst [vmem:[%s662_s3 + $0x20] sm:$0xff] %v529_v43 }
 0x110   :  { %v533_v45 = vpop.eup %532  ;;  %355 = vst [vmem:[%s662_s3 + $0x60] sm:$0xff] %v531_v44 }
 0x111   :  { %v535_v46 = vpop.eup %534  ;;  %350 = vst [vmem:[%s662_s3 + $0x38] sm:$0xff] %v533_v45 }
 0x112   :  { %v537_v47 = vpop.eup %536  ;;  %358 = vst [vmem:[%s662_s3 + $0x78] sm:$0xff] %v535_v46 }
 0x113   :  { %v539_v48 = vpop.eup %538  ;;  %348 = vst [vmem:[%s662_s3 + $0x28] sm:$0xff] %v537_v47 }
 0x114   :  { %356 = vst [vmem:[%s662_s3 + $0x68] sm:$0xff] %v539_v48 }

</bundles_post_ra>
